<compile_context>
chip_gen: v7x
topology: tpu7x:2x2x1
jax: 0.10.0
libtpu: 0.0.40
codegen_flags: <defaults>
</compile_context>

<pallas_src>
import functools

import jax
import jax.numpy as jnp
from jax.experimental import pallas as pl
from jax.experimental.pallas import tpu as pltpu


def _layernorm_cf_kernel(x_ref, gb_ref, o_ref, *, eps: float, d_model: int,
                         use_mxu_reductions: bool):
    # x_ref: (D, tT) -- D on sublanes, T on lanes.  Normalize over axis 0.
    x_in = x_ref[...]                                        # (D, tT), input dtype
    inv_d = jnp.float32(1.0 / d_model)
    g = gb_ref[:, 0:1].astype(jnp.float32)                   # (D, 1)
    b = gb_ref[:, 1:2].astype(jnp.float32)                   # (D, 1)

    if use_mxu_reductions:
        # bf16 path: let the MXU do the f32-accumulating reductions so the
        # VALU only does the per-element normalize (shifted-moments variance;
        # acceptable at bf16 input precision, clamped against cancellation).
        ones = jnp.ones((8, d_model), dtype=x_in.dtype)
        s = jnp.dot(ones, x_in, preferred_element_type=jnp.float32)[0:1, :]
        ss = jnp.dot(ones, x_in * x_in,
                     preferred_element_type=jnp.float32)[0:1, :]
        mean = s * inv_d                                     # (1, tT)
        var = jnp.maximum(ss * inv_d - mean * mean, 0.0)
        xc = x_in.astype(jnp.float32) - mean                 # (D, tT)
    else:
        # f32 path: two-pass variance (mean, then mean of centered squares);
        # the tile is already resident in VMEM so the extra pass is free of
        # HBM traffic and matches PyTorch's mean-subtracted variance closely.
        x = x_in.astype(jnp.float32)                         # (D, tT)
        mean = jnp.sum(x, axis=0, keepdims=True) * inv_d     # (1, tT)
        xc = x - mean
        var = jnp.sum(xc * xc, axis=0, keepdims=True) * inv_d

    inv = jax.lax.rsqrt(var + jnp.float32(eps))              # (1, tT)
    o_ref[...] = (xc * inv * g + b).astype(o_ref.dtype)


def _vmem_capacity_bytes() -> int:
    """Generation-aware VMEM capacity with a conservative (v7x) fallback."""
    try:
        cap = getattr(pltpu.get_tpu_info(), "vmem_capacity_bytes", None)
        if cap:
            return int(cap)
    except Exception:
        pass
    return 64 << 20


def _round_up(x: int, m: int) -> int:
    return -(-x // m) * m


def _choose_tile_t(T: int, d_pad: int, itemsize: int, budget_bytes: int,
                   params_bytes: int) -> int:
    """Largest lane-dense T tile that fits the VMEM budget.

    Charges: double-buffered input + output tiles (4 * d_pad * tT * itemsize),
    ~2 full-tile f32 temporaries inside the kernel, and the (already padded)
    gamma/beta block (params_bytes).
    """
    if T <= 128:
        return T                                   # full dim: always legal
    per_col = 4 * d_pad * itemsize + 2 * d_pad * 4
    avail = max(budget_bytes - params_bytes, 1 << 20)
    tt_max = (avail // per_col) // 128 * 128
    if tt_max < 128:
        tt_max = 128                               # smallest lane-dense tile
    # Target >= ~8 MiB of in+out HBM traffic per grid step so the ~0.35 us
    # per-step overhead stays negligible even at v7x's 3.2 TB/s.
    target = ((8 << 20) // max(2 * d_pad * itemsize, 1)) // 128 * 128
    tt = min(tt_max, max(128, target))
    if tt >= T:
        return T
    return tt


def layer_norm_channels_first(x, gamma, beta, eps: float = 1e-5):
    """x: (B, d_model, T). Returns (B, d_model, T); LayerNorm over d_model."""
    B, D, T = x.shape
    itemsize = jnp.dtype(x.dtype).itemsize
    # Sublane packing: 8 rows/vreg for 4-byte, 16 for 2-byte, 32 for 1-byte.
    d_pad = _round_up(D, 8 * max(1, 4 // max(itemsize, 1)))

    # gamma/beta packed into one (D, 2) block -> pads to (d_pad, 128) in VMEM.
    gb = jnp.stack([gamma.reshape(D), beta.reshape(D)], axis=1)      # (D, 2)
    gb_itemsize = jnp.dtype(gb.dtype).itemsize
    params_bytes = 2 * _round_up(D, 8) * 128 * gb_itemsize           # 2 buffers

    cap = _vmem_capacity_bytes()
    vmem_limit = int(max(32 << 20, min(cap - (16 << 20), 100 << 20)))
    budget = (vmem_limit * 3) // 5

    tT = _choose_tile_t(T, d_pad, itemsize, budget, params_bytes)
    num_t = -(-T // tT)
    # Guarantee >= 2 parallel grid steps (v7x has 2 TensorCores per chip).
    if B == 1 and num_t == 1 and T >= 256:
        tT = max(128, _round_up(-(-T // 2), 128))
        num_t = -(-T // tT)

    use_mxu = x.dtype == jnp.bfloat16

    kernel = functools.partial(_layernorm_cf_kernel, eps=eps, d_model=D,
                               use_mxu_reductions=use_mxu)

    out = pl.pallas_call(
        kernel,
        out_shape=jax.ShapeDtypeStruct((B, D, T), x.dtype),
        grid_spec=pltpu.PrefetchScalarGridSpec(
            num_scalar_prefetch=0,
            grid=(B, num_t),
            in_specs=[
                # x block: (1->squeezed, D, tT); kernel sees (D, tT)
                pl.BlockSpec((pl.Squeezed(), D, tT), lambda b, t: (b, 0, t)),
                # packed gamma/beta: (D, 2), shared across all grid steps
                pl.BlockSpec((D, 2), lambda b, t: (0, 0)),
            ],
            out_specs=pl.BlockSpec((pl.Squeezed(), D, tT),
                                   lambda b, t: (b, 0, t)),
        ),
        compiler_params=pltpu.CompilerParams(
            dimension_semantics=("parallel", "parallel"),
            vmem_limit_bytes=vmem_limit,
        ),
    )(x, gb)

    return out


def _reference(x, gamma, beta, eps):
    xf = x.astype(jnp.float32)
    mean = jnp.mean(xf, axis=1, keepdims=True)
    var = jnp.mean((xf - mean) ** 2, axis=1, keepdims=True)
    return ((xf - mean) * jax.lax.rsqrt(var + eps)
            * gamma.astype(jnp.float32)[None, :, None]
            + beta.astype(jnp.float32)[None, :, None])


if __name__ == "__main__":
    key = jax.random.PRNGKey(0)
    eps = 1e-5

    # Test 1: main small shape, f32 (two-pass path), D multiple of 8.
    B, D, T = 2, 32, 16
    kx, kg, kb, key = jax.random.split(key, 4)
    x = jax.random.normal(kx, (B, D, T), dtype=jnp.float32)
    gamma = 1.0 + 0.1 * jax.random.normal(kg, (D,), dtype=jnp.float32)
    beta = 0.1 * jax.random.normal(kb, (D,), dtype=jnp.float32)
    out = jax.block_until_ready(layer_norm_channels_first(x, gamma, beta, eps))
    ref = _reference(x, gamma, beta, eps)
    assert out.shape == (B, D, T)
    assert jnp.allclose(out, ref, atol=1e-4, rtol=1e-4), \
        float(jnp.max(jnp.abs(out - ref)))

    # Test 2: odd D (not a multiple of sublane packing) -- padded sublanes
    # must not leak into mean/var.
    B2, D2, T2 = 1, 13, 16
    kx, kg, kb, key = jax.random.split(key, 4)
    x2 = jax.random.normal(kx, (B2, D2, T2), dtype=jnp.float32)
    g2 = 1.0 + 0.1 * jax.random.normal(kg, (D2,), dtype=jnp.float32)
    b2 = 0.1 * jax.random.normal(kb, (D2,), dtype=jnp.float32)
    out2 = jax.block_until_ready(layer_norm_channels_first(x2, g2, b2, eps))
    ref2 = _reference(x2, g2, b2, eps)
    assert jnp.allclose(out2, ref2, atol=1e-4, rtol=1e-4), \
        float(jnp.max(jnp.abs(out2 - ref2)))

    # Test 3: bf16 input -- exercises the MXU-assisted reduction path.
    B3, D3, T3 = 2, 64, 256
    kx, kg, kb, key = jax.random.split(key, 4)
    x3 = jax.random.normal(kx, (B3, D3, T3), dtype=jnp.float32).astype(jnp.bfloat16)
    g3 = (1.0 + 0.1 * jax.random.normal(kg, (D3,), dtype=jnp.float32))
    b3 = (0.1 * jax.random.normal(kb, (D3,), dtype=jnp.float32))
    out3 = jax.block_until_ready(layer_norm_channels_first(x3, g3, b3, eps))
    ref3 = _reference(x3, g3, b3, eps)
    assert jnp.allclose(out3.astype(jnp.float32), ref3, atol=5e-2, rtol=5e-2), \
        float(jnp.max(jnp.abs(out3.astype(jnp.float32) - ref3)))

    print("KERNEL_OK")
</pallas_src>

<mosaic_0001>
module attributes {stable_mosaic.version = 11 : i64} {
  func.func @_layernorm_cf_kernel(%arg0: i32, %arg1: i32, %arg2: memref<1x32x16xf32, #tpu.memory_space<vmem>>, %arg3: memref<32x2xf32, #tpu.memory_space<vmem>>, %arg4: memref<1x32x16xf32, #tpu.memory_space<vmem>>) attributes {dimension_semantics = [#tpu.dimension_semantics<parallel>, #tpu.dimension_semantics<parallel>], iteration_bounds = array<i64: 2, 1>, scalar_prefetch = 0 : i64, scratch_operands = 0 : i64, tpu.core_type = #tpu.core_type<tc>, window_params = [{transform_indices = @transform_0, window_bounds = array<i64: 1, 32, 16>}, {pipeline_mode = #tpu.pipeline_mode<synchronous>, transform_indices = @transform_1, window_bounds = array<i64: 32, 2>}, {transform_indices = @transform_2, window_bounds = array<i64: 1, 32, 16>}]} {
    %c0 = arith.constant 0 : index
    %c0_0 = arith.constant 0 : index
    %c0_1 = arith.constant 0 : index
    %0 = vector.load %arg2[%c0, %c0_0, %c0_1] : memref<1x32x16xf32, #tpu.memory_space<vmem>>, vector<1x32x16xf32>
    %1 = vector.shape_cast %0 : vector<1x32x16xf32> to vector<32x16xf32>
    %c0_2 = arith.constant 0 : index
    %c0_3 = arith.constant 0 : index
    %2 = vector.load %arg3[%c0_2, %c0_3] : memref<32x2xf32, #tpu.memory_space<vmem>>, vector<32x1xf32>
    %c0_4 = arith.constant 0 : index
    %c1 = arith.constant 1 : index
    %3 = vector.load %arg3[%c0_4, %c1] : memref<32x2xf32, #tpu.memory_space<vmem>>, vector<32x1xf32>
    %cst = arith.constant dense<0.000000e+00> : vector<16xf32>
    %4 = vector.multi_reduction <add>, %1, %cst [0] : vector<32x16xf32> to vector<16xf32>
    %5 = vector.shape_cast %4 : vector<16xf32> to vector<1x16xf32>
    %cst_5 = arith.constant 3.125000e-02 : f32
    %6 = vector.broadcast %cst_5 : f32 to vector<1x16xf32>
    %7 = arith.mulf %5, %6 : vector<1x16xf32>
    %8 = vector.broadcast %7 : vector<1x16xf32> to vector<32x16xf32>
    %9 = arith.subf %1, %8 : vector<32x16xf32>
    %10 = arith.mulf %9, %9 : vector<32x16xf32>
    %cst_6 = arith.constant dense<0.000000e+00> : vector<16xf32>
    %11 = vector.multi_reduction <add>, %10, %cst_6 [0] : vector<32x16xf32> to vector<16xf32>
    %12 = vector.shape_cast %11 : vector<16xf32> to vector<1x16xf32>
    %cst_7 = arith.constant 3.125000e-02 : f32
    %13 = vector.broadcast %cst_7 : f32 to vector<1x16xf32>
    %14 = arith.mulf %12, %13 : vector<1x16xf32>
    %cst_8 = arith.constant 9.99999974E-6 : f32
    %15 = vector.broadcast %cst_8 : f32 to vector<1x16xf32>
    %16 = arith.addf %14, %15 : vector<1x16xf32>
    %17 = math.rsqrt %16 : vector<1x16xf32>
    %18 = vector.broadcast %17 : vector<1x16xf32> to vector<32x16xf32>
    %19 = arith.mulf %9, %18 : vector<32x16xf32>
    %20 = vector.broadcast %2 : vector<32x1xf32> to vector<32x16xf32>
    %21 = arith.mulf %19, %20 : vector<32x16xf32>
    %22 = vector.broadcast %3 : vector<32x1xf32> to vector<32x16xf32>
    %23 = arith.addf %21, %22 : vector<32x16xf32>
    %c0_9 = arith.constant 0 : index
    %c0_10 = arith.constant 0 : index
    %c0_11 = arith.constant 0 : index
    %24 = vector.load %arg4[%c0_9, %c0_10, %c0_11] : memref<1x32x16xf32, #tpu.memory_space<vmem>>, vector<1x32x16xf32>
    %25 = vector.shape_cast %24 : vector<1x32x16xf32> to vector<32x16xf32>
    %26 = vector.shape_cast %23 : vector<32x16xf32> to vector<1x32x16xf32>
    tpu.vector_store %arg4[%c0_9, %c0_10, %c0_11], %26 {strides = array<i32>} : memref<1x32x16xf32, #tpu.memory_space<vmem>>, vector<1x32x16xf32>,
    return
  }
  func.func @transform_0(%arg0: i32, %arg1: i32) -> (i32, i32, i32) {
    %c0_i32 = arith.constant 0 : i32
    %c0_i32_0 = arith.constant 0 : i32
    return %arg0, %c0_i32, %arg1 : i32, i32, i32
  }
  func.func @transform_1(%arg0: i32, %arg1: i32) -> (i32, i32) {
    %c0_i32 = arith.constant 0 : i32
    %c0_i32_0 = arith.constant 0 : i32
    %c0_i32_1 = arith.constant 0 : i32
    return %c0_i32, %c0_i32_0 : i32, i32
  }
  func.func @transform_2(%arg0: i32, %arg1: i32) -> (i32, i32, i32) {
    %c0_i32 = arith.constant 0 : i32
    %c0_i32_0 = arith.constant 0 : i32
    return %arg0, %c0_i32, %arg1 : i32, i32, i32
  }
}

</mosaic_0001>

<bundles_post_ra>
// kernel: tpu_custom_call.1
= control target key start
LH: loop header
LB: loop body
LE: loop exit
PB: predicated region body
PF: predicated region fallthrough
CT: control target
= control target key end

     0   :  { %s443_s9 = smov 0   ;;  %s445_s10 = smov 0   ;;  %s507_s0 = inlined_call_operand.vmem [shape: f32[2,32,16], index: 0, kind: input, shape index: {}]   ;;  %s508_s1 = inlined_call_operand.vmem [shape: f32[32,2], index: 1, kind: input, shape index: {}]   ;;  %s509_s2 = inlined_call_operand.vmem [shape: f32[2,32,16], index: 2, kind: output, shape index: {}]  }
   0x1   :  { %s447_s11 = smov 0  }
   0x2 LB: > { %s24_s12 = sadd.s32 1, %s420_s10  ;;  %p361_p0 = scmp.ge.s32.totalorder %s424_s11, 1  ;;  %s424_s11 = sphi %s447_s11, %s12_s11   ;;  %s420_s10 = sphi %s445_s10, %s511_s10   ;;  %s416_s9 = sphi %s443_s9, %s510_s9  }
   0x3   : > { %p26_p1 = scmp.ge.s32.totalorder %s24_s12, 2  ;;  %p131_p2 = scmp.lt.s32.totalorder %s424_s11, 3 }
   0x5   : > { %s513_s12 = smov (%p26_p1, %s24_s12), 0  ;;  %p132_p3 = pnand %p361_p0, %p131_p2 }
   0x6   : > { %v181_v0 = vld [vmem:[%s508_s1 + $0x10] sm:$0xff] (!%p132_p3)  ;;  %v179_v1 = vld [vmem:[%s508_s1] sm:$0xff] (!%p132_p3)  ;;  %v426_v2 = vmov (!%p132_p3), 0   ;;  %v182_v3 = vld [vmem:[%s508_s1 + $0x18] sm:$0xff] (!%p132_p3)  ;;  %p159_p4 = scmp.lt.s32.totalorder (!%p132_p3), %s416_s9, 1  ;;  %v427_v5 = vmov (!%p132_p3), 1  }
   0x7   : > { %135 = sbr.rel (%p132_p3) target bundleno = 152 (0x98), region = 28  ;;  %397 = vset.pattern.permute.xlu1 (!%p132_p3), %v426_v2  ;;  %396 = vset.pattern.permute.xlu0 (!%p132_p3), %v426_v2  ;;  %v180_v4 = vld [vmem:[%s508_s1 + $0x8] sm:$0xff] (!%p132_p3)  ;;  %vm183_vm0 = vcmask (!%p132_p3), 130048  }
   0x8   : > { %238 = vperm.xlu1 (!%p132_p3), %397, %v181_v0   ;;  %228 = vperm.xlu0 (!%p132_p3), %396, %v179_v1  }
   0xc   : > { %243 = vperm.xlu1 (!%p132_p3), %397, %v182_v3   ;;  %233 = vperm.xlu0 (!%p132_p3), %396, %v180_v4  }
   0xe   : > { %s515_s9 = smov (!%p159_p4, %s416_s9), 1 }
   0xf   : > { %s368_s21 = sshll.u32 %s515_s9, 5 }
  0x10   : > { %399 = vset.pattern.permute.xlu1 %v427_v5  ;;  %398 = vset.pattern.permute.xlu0 %v427_v5  ;;  %s166_s24 = scalar_lea.vmem %s507_s0, %s368_s21  ;;  %s174_s27 = scalar_lea.vmem %s509_s2, %s368_s21 }
  0x11   : > { %255 = vperm.xlu1 %399, %v180_v4   ;;  %251 = vperm.xlu0 %398, %v179_v1   ;;  %v175_v6 = vld [vmem:[%s166_s24] sm:$0xff]  ;;  %v176_v7 = vld [vmem:[%s166_s24 + $0x8] sm:$0xff]  ;;  %v177_v10 = vld [vmem:[%s166_s24 + $0x10] sm:$0xff] }
  0x12   : > { %v184_v8 = vsel %vm183_vm0, %v175_v6, 0.0  ;;  %v185_v9 = vsel %vm183_vm0, %v176_v7, 0.0  ;;  %v187_v12 = vsel %vm183_vm0, %v177_v10, 0.0  ;;  %v178_v13 = vld [vmem:[%s166_s24 + $0x18] sm:$0xff] }
  0x13   : > { %v186_v11 = vadd.f32 %v185_v9, %v184_v8  ;;  %v189_v15 = vsel %vm183_vm0, %v178_v13, 0.0 }
  0x15   : > { %259 = vperm.xlu1 %399, %v181_v0   ;;  %263 = vperm.xlu0 %398, %v182_v3   ;;  %v188_v14 = vadd.f32 %v187_v12, %v186_v11 }
  0x17   : > { %v190_v16 = vadd.f32 %v189_v15, %v188_v14 }
  0x19   : > { %v191_v17 = vrot.slane %v190_v16, 4 }
  0x1b   : > { %v192_v18 = vadd.f32 %v191_v17, %v190_v16 }
  0x1d   : > { %v193_v19 = vrot.slane %v192_v18, 2 }
  0x1f   : > { %v194_v20 = vadd.f32 %v193_v19, %v192_v18 }
  0x21   : > { %v195_v21 = vrot.slane %v194_v20, 1 }
  0x23   : > { %v196_v22 = vadd.f32 %v195_v21, %v194_v20 }
  0x25   : > { %v197_v23 = vmul.f32 0.03125, %v196_v22 }
  0x27   : > { %v198_v24 = vsub.f32 %v175_v6, %v197_v23  ;;  %v199_v25 = vsub.f32 %v176_v7, %v197_v23  ;;  %v200_v26 = vsub.f32 %v177_v10, %v197_v23  ;;  %v201_v29 = vsub.f32 %v178_v13, %v197_v23 }
  0x29   : > { %v202_v27 = vmul.f32 %v198_v24, %v198_v24  ;;  %v203_v28 = vmul.f32 %v199_v25, %v199_v25  ;;  %v204_v30 = vmul.f32 %v200_v26, %v200_v26  ;;  %v205_v34 = vmul.f32 %v201_v29, %v201_v29 }
  0x2b   : > { %v206_v31 = vsel %vm183_vm0, %v202_v27, 0.0  ;;  %v207_v32 = vsel %vm183_vm0, %v203_v28, 0.0  ;;  %v209_v35 = vsel %vm183_vm0, %v204_v30, 0.0  ;;  %v211_v37 = vsel %vm183_vm0, %v205_v34, 0.0 }
  0x2c   : > { %v208_v33 = vadd.f32 %v207_v32, %v206_v31 }
  0x2e   : > { %v210_v36 = vadd.f32 %v209_v35, %v208_v33 }
  0x30   : > { %v212_v38 = vadd.f32 %v211_v37, %v210_v36 }
  0x32   : > { %v213_v39 = vrot.slane %v212_v38, 4 }
  0x34   : > { %v214_v40 = vadd.f32 %v213_v39, %v212_v38 }
  0x36   : > { %v215_v41 = vrot.slane %v214_v40, 2 }
  0x38   : > { %v216_v42 = vadd.f32 %v215_v41, %v214_v40 }
  0x3a   : > { %v217_v43 = vrot.slane %v216_v42, 1 }
  0x3c   : > { %v218_v44 = vadd.f32 %v217_v43, %v216_v42 }
  0x3e   : > { %v219_v45 = vmul.f32 0.03125, %v218_v44 }
  0x40   : > { %v220_v46 = vadd.f32 1e-05, %v219_v45 }
  0x42   : > { %400 = vrsqrt.f32 %v220_v46 }
  0x4c   : > { %v401_v49 = vpop.eup %400 }
  0x4d   : > { %v222_v50 = vmul.f32 %v401_v49, %v198_v24  ;;  %v223_v53 = vmul.f32 %v401_v49, %v199_v25  ;;  %v224_v54 = vmul.f32 %v401_v49, %v200_v26  ;;  %v225_v56 = vmul.f32 %v401_v49, %v201_v29 }
  0x87   : > { %v239_v47 = vpop.permute.xlu1 %238  ;;  %v229_v48 = vpop.permute.xlu0 %228 }
  0x88   : > { %v246_v55 = vmul.f32 %v229_v48, %v222_v50  ;;  %v248_v62 = vmul.f32 %v239_v47, %v224_v54 }
  0x8b   : > { %v244_v51 = vpop.permute.xlu1 %243  ;;  %v234_v52 = vpop.permute.xlu0 %233 }
  0x8c   : > { %v247_v57 = vmul.f32 %v234_v52, %v223_v53  ;;  %v249_v63 = vmul.f32 %v244_v51, %v225_v56 }
  0x90   : > { %v256_v58 = vpop.permute.xlu1 %255  ;;  %v252_v59 = vpop.permute.xlu0 %251 }
  0x91   : > { %v267_v60 = vadd.f32 %v256_v58, %v247_v57  ;;  %v266_v61 = vadd.f32 %v252_v59, %v246_v55 }
  0x93   : > { %271 = vst.msk [vmem:[%s174_s27 + $0x8] sm:$0xff] %vm183_vm0, %v267_v60  ;;  %270 = vst.msk [vmem:[%s174_s27] sm:$0xff] %vm183_vm0, %v266_v61 }
  0x94   : > { %v260_v0 = vpop.permute.xlu1 %259  ;;  %v264_v1 = vpop.permute.xlu0 %263 }
  0x95   : > { %v268_v2 = vadd.f32 %v260_v0, %v248_v62  ;;  %v269_v3 = vadd.f32 %v264_v1, %v249_v63 }
  0x97   : > { %272 = vst.msk [vmem:[%s174_s27 + $0x10] sm:$0xff] %vm183_vm0, %v268_v2  ;;  %273 = vst.msk [vmem:[%s174_s27 + $0x18] sm:$0xff] %vm183_vm0, %v269_v3 }
  0x98 PF: > { %s12_s11 = sadd.s32 1, %s424_s11   ;;  %s510_s9 = smov %s420_s10 }
  0x99   : > { %p9_p5 = scmp.ge.s32.totalorder %s12_s11, 4   ;;  %s511_s10 = smov %s513_s12 }
  0x9b   :  { %11 = sbr.rel (!%p9_p5) target bundleno = 2 (0x2), region = 58 }

</bundles_post_ra>
